<compile_context>
chip_gen: v5e
topology: v5e:2x2
jax: 0.10.0
libtpu: 0.0.40
codegen_flags: <defaults>
</compile_context>

<pallas_src>
import functools

import jax
import jax.numpy as jnp
from jax.experimental import pallas as pl
from jax.experimental.pallas import tpu as pltpu


def _pool_kernel(x_ref, w5t_ref, shift_ref, pooled_ref, acc_ref, *,
                 thw, tile_thw, needs_mask, compute_dtype):
    """Per-(batch, THW-tile) step: conv_5 (BN-scale folded) + shift + ReLU,
    accumulate the pooled sum; finalize writes the lane-dense pooled mean."""
    t = pl.program_id(1)
    last = pl.num_programs(1) - 1

    @pl.when(t == 0)
    def _init():
        acc_ref[...] = jnp.zeros_like(acc_ref)

    # Cast the activation tile in-kernel (input stays f32 in HBM; no extra
    # wrapper-side HBM pass).  (C_in, tile_thw)
    x = x_ref[0].astype(compute_dtype)
    # conv_5 (1x1x1, no bias) with eval-BN scale pre-folded into the weight:
    # (dim_inner, C_in) @ (C_in, tile) on the MXU, f32 accumulation.
    h = jnp.dot(w5t_ref[...], x, preferred_element_type=jnp.float32)
    h = jnp.maximum(h + shift_ref[...], 0.0)            # BN shift + ReLU, f32

    if needs_mask:
        # Padding mask only on the last (ragged) tile; all other tiles take
        # the unmasked fast path.
        @pl.when(t != last)
        def _acc_fast():
            acc_ref[...] += jnp.sum(h, axis=1, keepdims=True)

        @pl.when(t == last)
        def _acc_masked():
            valid = thw - t * tile_thw
            col = jax.lax.broadcasted_iota(jnp.int32, h.shape, 1)
            hm = jnp.where(col < valid, h, 0.0)
            acc_ref[...] += jnp.sum(hm, axis=1, keepdims=True)
    else:
        acc_ref[...] += jnp.sum(h, axis=1, keepdims=True)

    @pl.when(t == last)
    def _finalize():
        pooled = acc_ref[...] * (1.0 / thw)              # (dim_inner, 1), f32
        # Lane-dense store: (1, dim_inner) row, no masked partial stores.
        pooled_ref[0] = pooled.T.astype(pooled_ref.dtype)


def _tail_kernel(pooled_ref, wlin_ref, wproj_ref, bproj_ref, out_ref, *,
                 compute_dtype):
    """Batched tail: lin_5 + ReLU, projection + bias, softmax.  Weights arrive
    in f32 and are cast to the MXU compute dtype in-kernel (no convert HLOs)."""
    p = pooled_ref[...].astype(compute_dtype)                       # (B, dim_inner)
    wlin = wlin_ref[...].astype(compute_dtype)                      # (dim_inner, dim_out)
    y = jnp.dot(p, wlin, preferred_element_type=jnp.float32)
    y = jnp.maximum(y, 0.0)                                         # (B, dim_out), f32
    wproj = wproj_ref[...].astype(compute_dtype)                    # (dim_out, classes)
    logits = jnp.dot(y.astype(compute_dtype), wproj,
                     preferred_element_type=jnp.float32) + bproj_ref[...]
    # Softmax over classes (eval path); mean over the (1,1,1) dims is a no-op.
    m = jnp.max(logits, axis=-1, keepdims=True)
    e = jnp.exp(logits - m)
    out_ref[...] = (e / jnp.sum(e, axis=-1, keepdims=True)).astype(out_ref.dtype)


def x3d_head_forward(x_ncthw, params, *, eps=1e-5,
                     compute_dtype=jnp.bfloat16, max_thw_tile=2048):
    """x_ncthw: (B, C_in, T, H, W), NCDHW like the PyTorch module.

    params (conv weights pre-flattened over their 1x1x1 kernels):
      w5:    (C_in, dim_inner)      conv_5.weight^T
      bn_*:  (dim_inner,)           conv_5_bn gamma/beta/running_mean/running_var
      wlin5: (dim_inner, dim_out)   lin_5.weight^T
      wproj: (dim_out, num_classes) projection.weight^T
      bproj: (num_classes,)         projection.bias
    """
    B, C_in, T, H, W = x_ncthw.shape
    THW = T * H * W

    w5 = params["w5"]
    gamma = params["bn_gamma"]
    beta = params["bn_beta"]
    rmean = params["bn_mean"]
    rvar = params["bn_var"]
    wlin = params["wlin5"]
    wproj = params["wproj"]
    bproj = params["bproj"]

    dim_inner = w5.shape[1]
    num_classes = wproj.shape[1]

    # Fold eval-mode BN into the conv weight (scale) and a per-channel shift.
    # The fold is done in f32 BEFORE any bf16 cast of the weight.
    inv_std = 1.0 / jnp.sqrt(rvar.astype(jnp.float32) + eps)
    bn_scale = gamma.astype(jnp.float32) * inv_std                       # (dim_inner,)
    bn_shift = (beta.astype(jnp.float32)
                - rmean.astype(jnp.float32) * bn_scale)                  # (dim_inner,)
    w5_t = (jnp.transpose(w5).astype(jnp.float32)
            * bn_scale[:, None]).astype(compute_dtype)                   # (dim_inner, C_in)
    bn_shift = bn_shift.reshape(dim_inner, 1)                            # f32

    # NCDHW -> (B, C_in, THW): a free, contiguous reshape.  Keep the ORIGINAL
    # dtype in HBM; the compute-dtype cast happens in-kernel per tile.
    x = x_ncthw.reshape(B, C_in, THW)

    # THW tile: prefer the full slab (one contiguous DMA per batch, no mask,
    # fills the wide MXU); otherwise the largest lane-aligned tile <= max_thw_tile
    # that keeps 2x double-buffered input tiles comfortably inside scoped VMEM.
    itemsize = jnp.dtype(x.dtype).itemsize
    if THW <= max_thw_tile:
        tile_thw = THW
    else:
        tile_thw = max(128, (max_thw_tile // 128) * 128)
        while tile_thw > 128 and 2 * C_in * tile_thw * itemsize > 16 * 1024 * 1024:
            tile_thw = max(128, (tile_thw // 2 // 128) * 128)
    num_t = pl.cdiv(THW, tile_thw)
    needs_mask = (num_t * tile_thw) != THW

    pooled = pl.pallas_call(
        functools.partial(_pool_kernel, thw=THW, tile_thw=tile_thw,
                          needs_mask=needs_mask, compute_dtype=compute_dtype),
        out_shape=jax.ShapeDtypeStruct((B, 1, dim_inner), jnp.float32),
        grid_spec=pltpu.PrefetchScalarGridSpec(
            num_scalar_prefetch=0,
            grid=(B, num_t),                       # reduction axis (THW tiles) last
            in_specs=[
                pl.BlockSpec((1, C_in, tile_thw), lambda b, t: (b, 0, t)),
                pl.BlockSpec((dim_inner, C_in), lambda b, t: (0, 0)),
                pl.BlockSpec((dim_inner, 1), lambda b, t: (0, 0)),
            ],
            out_specs=pl.BlockSpec((1, 1, dim_inner), lambda b, t: (b, 0, 0)),
            scratch_shapes=[pltpu.VMEM((dim_inner, 1), jnp.float32)],
        ),
        compiler_params=pltpu.CompilerParams(
            dimension_semantics=("parallel", "arbitrary"),
            vmem_limit_bytes=32 * 1024 * 1024),
    )(x, w5_t, bn_shift)

    pooled = pooled.reshape(B, dim_inner)          # free squeeze of the middle 1

    bproj2 = bproj.reshape(1, num_classes).astype(jnp.float32)

    # Tail: one tiny single-shot call (no grid) -> whole-array VMEM blocks,
    # single-buffered f32 weights, matmuls batched over B, cast in-kernel.
    return pl.pallas_call(
        functools.partial(_tail_kernel, compute_dtype=compute_dtype),
        out_shape=jax.ShapeDtypeStruct((B, num_classes), jnp.float32),
        compiler_params=pltpu.CompilerParams(
            vmem_limit_bytes=32 * 1024 * 1024),
    )(pooled, wlin, wproj, bproj2)


def _reference(x_ncthw, params, eps=1e-5):
    """Pure-JAX f32 reference of the same eval-mode forward pass."""
    B, C_in, T, H, W = x_ncthw.shape
    x = jnp.transpose(x_ncthw, (0, 2, 3, 4, 1)).reshape(B, -1, C_in)
    h = x @ params["w5"]
    scale = params["bn_gamma"] / jnp.sqrt(params["bn_var"] + eps)
    shift = params["bn_beta"] - params["bn_mean"] * scale
    h = jnp.maximum(h * scale + shift, 0.0)
    pooled = jnp.mean(h, axis=1)                       # (B, dim_inner)
    y = jnp.maximum(pooled @ params["wlin5"], 0.0)     # (B, dim_out)
    logits = y @ params["wproj"] + params["bproj"]     # (B, num_classes)
    return jax.nn.softmax(logits, axis=-1)


if __name__ == "__main__":
    # Small shapes consistent with the module: x is (B, C, T, H, W).
    B, C_in, T, H, W = 2, 24, 4, 8, 8                  # THW = 256
    dim_inner, dim_out, num_classes = 48, 64, 16

    key = jax.random.PRNGKey(0)
    ks = jax.random.split(key, 9)

    x = jax.random.normal(ks[0], (B, C_in, T, H, W), dtype=jnp.float32)

    params = {
        "w5": jax.random.normal(ks[1], (C_in, dim_inner), jnp.float32) * 0.1,
        "bn_gamma": jnp.ones((dim_inner,), jnp.float32)
                    + 0.05 * jax.random.normal(ks[2], (dim_inner,), jnp.float32),
        "bn_beta": 0.05 * jax.random.normal(ks[3], (dim_inner,), jnp.float32),
        "bn_mean": 0.1 * jax.random.normal(ks[4], (dim_inner,), jnp.float32),
        "bn_var": jnp.abs(jax.random.normal(ks[5], (dim_inner,), jnp.float32)) + 0.5,
        "wlin5": jax.random.normal(ks[6], (dim_inner, dim_out), jnp.float32) * 0.1,
        "wproj": jax.random.normal(ks[7], (dim_out, num_classes), jnp.float32) * 0.1,
        "bproj": jnp.linspace(-0.1, 0.1, num_classes).astype(jnp.float32),
    }

    ref = _reference(x, params)

    # 1) f32 path, full-THW tile (single tile, no mask).
    out = jax.block_until_ready(
        x3d_head_forward(x, params, compute_dtype=jnp.float32))
    assert out.shape == (B, num_classes)
    assert jnp.allclose(out, ref, atol=1e-5, rtol=1e-5), "f32 full-tile mismatch"

    # 2) f32 path, forced multi-tile THW accumulation (2 exact 128-wide tiles).
    out_t = jax.block_until_ready(
        x3d_head_forward(x, params, compute_dtype=jnp.float32, max_thw_tile=128))
    assert jnp.allclose(out_t, ref, atol=1e-5, rtol=1e-5), "f32 tiled mismatch"

    # 3) ragged THW (192 = 1.5 tiles) exercises the last-tile masking path.
    x2 = jax.random.normal(ks[8], (B, C_in, 3, 8, 8), dtype=jnp.float32)
    ref2 = _reference(x2, params)
    out2 = jax.block_until_ready(
        x3d_head_forward(x2, params, compute_dtype=jnp.float32, max_thw_tile=128))
    assert jnp.allclose(out2, ref2, atol=1e-5, rtol=1e-5), "ragged-THW mismatch"

    # 4) default path: bf16 MXU operands, f32 elementwise/accumulation.
    #    (bf16 operands are an intentional accuracy/perf tradeoff.)
    out_bf16 = jax.block_until_ready(x3d_head_forward(x, params))
    assert jnp.allclose(out_bf16, ref, atol=2e-2), "bf16 mismatch vs reference"

    print("KERNEL_OK")
</pallas_src>

<mosaic_0001>
module attributes {stable_mosaic.version = 11 : i64} {
  func.func @_pool_kernel(%arg0: i32, %arg1: i32, %arg2: memref<1x24x256xf32, #tpu.memory_space<vmem>>, %arg3: memref<48x24xf32, #tpu.memory_space<vmem>>, %arg4: memref<48x1xf32, #tpu.memory_space<vmem>>, %arg5: memref<1x1x48xf32, #tpu.memory_space<vmem>>, %arg6: memref<48x1xf32, #tpu.memory_space<vmem>>) attributes {dimension_semantics = [#tpu.dimension_semantics<parallel>, #tpu.dimension_semantics<arbitrary>], iteration_bounds = array<i64: 2, 1>, scalar_prefetch = 0 : i64, scratch_operands = 1 : i64, tpu.core_type = #tpu.core_type<tc>, window_params = [{transform_indices = @transform_0, window_bounds = array<i64: 1, 24, 256>}, {pipeline_mode = #tpu.pipeline_mode<synchronous>, transform_indices = @transform_1, window_bounds = array<i64: 48, 24>}, {pipeline_mode = #tpu.pipeline_mode<synchronous>, transform_indices = @transform_2, window_bounds = array<i64: 48, 1>}, {transform_indices = @transform_3, window_bounds = array<i64: 1, 1, 48>}]} {
    %c0_i32 = arith.constant 0 : i32
    %0 = arith.cmpi eq, %arg1, %c0_i32 : i32
    %1 = arith.extui %0 : i1 to i32
    %c0_i32_0 = arith.constant 0 : i32
    %2 = arith.cmpi ne, %1, %c0_i32_0 : i32
    scf.if %2 {
      %cst_15 = arith.constant 0.000000e+00 : f32
      %20 = vector.broadcast %cst_15 : f32 to vector<48x1xf32>
      %c0_16 = arith.constant 0 : index
      %c0_17 = arith.constant 0 : index
      %21 = vector.load %arg6[%c0_16, %c0_17] : memref<48x1xf32, #tpu.memory_space<vmem>>, vector<48x1xf32>
      tpu.vector_store %arg6[%c0_16, %c0_17], %20 {strides = array<i32>} : memref<48x1xf32, #tpu.memory_space<vmem>>, vector<48x1xf32>,
    } else {
    }
    %c0 = arith.constant 0 : index
    %c0_1 = arith.constant 0 : index
    %c0_2 = arith.constant 0 : index
    %3 = vector.load %arg2[%c0, %c0_1, %c0_2] : memref<1x24x256xf32, #tpu.memory_space<vmem>>, vector<1x24x256xf32>
    %4 = vector.shape_cast %3 : vector<1x24x256xf32> to vector<24x256xf32>
    %c0_3 = arith.constant 0 : index
    %c0_4 = arith.constant 0 : index
    %5 = vector.load %arg3[%c0_3, %c0_4] : memref<48x24xf32, #tpu.memory_space<vmem>>, vector<48x24xf32>
    %cst = arith.constant dense<0.000000e+00> : vector<48x256xf32>
    %6 = tpu.matmul %5, %4, %cst {dimension_numbers = #tpu.dot_dimension_numbers<[1], [0], [0], [1], [0, 0, 1, 1], [], []>} : vector<48x24xf32>, vector<24x256xf32>, vector<48x256xf32> -> vector<48x256xf32>
    %c0_5 = arith.constant 0 : index
    %c0_6 = arith.constant 0 : index
    %7 = vector.load %arg4[%c0_5, %c0_6] : memref<48x1xf32, #tpu.memory_space<vmem>>, vector<48x1xf32>
    %8 = vector.broadcast %7 : vector<48x1xf32> to vector<48x256xf32>
    %9 = arith.addf %6, %8 : vector<48x256xf32>
    %cst_7 = arith.constant 0.000000e+00 : f32
    %10 = vector.broadcast %cst_7 : f32 to vector<48x256xf32>
    %11 = arith.maximumf %9, %10 : vector<48x256xf32>
    %c0_8 = arith.constant 0 : index
    %c0_9 = arith.constant 0 : index
    %12 = vector.load %arg6[%c0_8, %c0_9] : memref<48x1xf32, #tpu.memory_space<vmem>>, vector<48x1xf32>
    %cst_10 = arith.constant dense<0.000000e+00> : vector<48xf32>
    %13 = vector.multi_reduction <add>, %11, %cst_10 [1] : vector<48x256xf32> to vector<48xf32>
    %14 = vector.shape_cast %13 : vector<48xf32> to vector<48x1xf32>
    %15 = arith.addf %12, %14 : vector<48x1xf32>
    %c0_11 = arith.constant 0 : index
    %c0_12 = arith.constant 0 : index
    %16 = vector.load %arg6[%c0_11, %c0_12] : memref<48x1xf32, #tpu.memory_space<vmem>>, vector<48x1xf32>
    tpu.vector_store %arg6[%c0_11, %c0_12], %15 {strides = array<i32>} : memref<48x1xf32, #tpu.memory_space<vmem>>, vector<48x1xf32>,
    %c0_i32_13 = arith.constant 0 : i32
    %17 = arith.cmpi eq, %arg1, %c0_i32_13 : i32
    %18 = arith.extui %17 : i1 to i32
    %c0_i32_14 = arith.constant 0 : i32
    %19 = arith.cmpi ne, %18, %c0_i32_14 : i32
    scf.if %19 {
      %c0_15 = arith.constant 0 : index
      %c0_16 = arith.constant 0 : index
      %20 = vector.load %arg6[%c0_15, %c0_16] : memref<48x1xf32, #tpu.memory_space<vmem>>, vector<48x1xf32>
      %cst_17 = arith.constant 3.906250e-03 : f32
      %21 = vector.broadcast %cst_17 : f32 to vector<48x1xf32>
      %22 = arith.mulf %20, %21 : vector<48x1xf32>
      %23 = tpu.transpose %22, [1, 0] : vector<48x1xf32> -> vector<1x48xf32>
      %c0_18 = arith.constant 0 : index
      %c0_19 = arith.constant 0 : index
      %c0_20 = arith.constant 0 : index
      %24 = vector.load %arg5[%c0_18, %c0_19, %c0_20] : memref<1x1x48xf32, #tpu.memory_space<vmem>>, vector<1x1x48xf32>
      %25 = vector.shape_cast %24 : vector<1x1x48xf32> to vector<1x48xf32>
      %26 = vector.shape_cast %23 : vector<1x48xf32> to vector<1x1x48xf32>
      tpu.vector_store %arg5[%c0_18, %c0_19, %c0_20], %26 {strides = array<i32>} : memref<1x1x48xf32, #tpu.memory_space<vmem>>, vector<1x1x48xf32>,
    } else {
    }
    return
  }
  func.func @transform_0(%arg0: i32, %arg1: i32) -> (i32, i32, i32) {
    %c0_i32 = arith.constant 0 : i32
    %c0_i32_0 = arith.constant 0 : i32
    return %arg0, %c0_i32, %arg1 : i32, i32, i32
  }
  func.func @transform_1(%arg0: i32, %arg1: i32) -> (i32, i32) {
    %c0_i32 = arith.constant 0 : i32
    %c0_i32_0 = arith.constant 0 : i32
    %c0_i32_1 = arith.constant 0 : i32
    return %c0_i32, %c0_i32_0 : i32, i32
  }
  func.func @transform_2(%arg0: i32, %arg1: i32) -> (i32, i32) {
    %c0_i32 = arith.constant 0 : i32
    %c0_i32_0 = arith.constant 0 : i32
    %c0_i32_1 = arith.constant 0 : i32
    return %c0_i32, %c0_i32_0 : i32, i32
  }
  func.func @transform_3(%arg0: i32, %arg1: i32) -> (i32, i32, i32) {
    %c0_i32 = arith.constant 0 : i32
    %c0_i32_0 = arith.constant 0 : i32
    %c0_i32_1 = arith.constant 0 : i32
    return %arg0, %c0_i32, %c0_i32_0 : i32, i32, i32
  }
}

</mosaic_0001>

<bundles_post_ra>
// kernel: tpu_custom_call.1
= control target key start
LH: loop header
LB: loop body
LE: loop exit
PB: predicated region body
PF: predicated region fallthrough
CT: control target
= control target key end

     0   :  { %8 = vsyncpa [#allocation4], 0  ;;  %s870_s0 = inlined_call_operand.vmem [shape: f32[2,24,256], index: 0, kind: input, shape index: {}]   ;;  %s871_s1 = inlined_call_operand.vmem [shape: f32[48,24], index: 1, kind: input, shape index: {}]   ;;  %s872_s2 = inlined_call_operand.vmem [shape: f32[48,1], index: 2, kind: input, shape index: {}]   ;;  %s873_s3 = inlined_call_operand.hbm [shape: f32[2,1,48], index: 3, kind: output, shape index: {}]  }
   0x1   :  { %10 = vsyncpa [#allocation4 + $0x1], 0  ;;  %s713_s12 = smov 0   ;;  %s715_s13 = smov 0  }
   0x2   :  { %s717_s14 = smov 0   ;;  %s719_s15 = smov 0  }
   0x3   :  { %s721_s16 = smov 0   ;;  %s723_s17 = smov 0  }
   0x4 LB: > { %s524_s18 = sadd.s32 4294967295, %s689_s17   ;;  %s525_s19 = sadd.s32 4294967294, %s689_s17   ;;  %s689_s17 = sphi %s723_s17, %s16_s17   ;;  %s685_s16 = sphi %s721_s16, %s880_s16   ;;  %s681_s15 = sphi %s719_s15, %s879_s15   ;;  %s677_s14 = sphi %s717_s14, %s878_s14   ;;  %s673_s13 = sphi %s715_s13, %s877_s13   ;;  %s669_s12 = sphi %s713_s12, %s876_s12  }
   0x5   : > { %s28_s20 = sadd.s32 1, %s685_s16  ;;  %s105_s21 = sadd.s32 1, %s677_s14 }
   0x6   : > { %p30_p0 = scmp.ge.s32.totalorder %s28_s20, 2  ;;  %p115_p1 = scmp.ne.s32.totalorder %s677_s14, %s673_s13 }
   0x7   : > { %p116_p2 = scmp.eq.s32.totalorder %s524_s18, 1  ;;  %p121_p3 = scmp.ne.s32.totalorder %s673_s13, %s669_s12 }
   0x8   : > { %s882_s20 = smov (%p30_p0, %s28_s20), 0  ;;  %p122_p5 = scmp.eq.s32.totalorder %s525_s19, 1 }
   0x9   : > { %p753_p4 = por %p116_p2, %p115_p1  ;;  %s102_s23 = ssub.s32 %s685_s16, %s882_s20 }
   0xa   : > { %p528_p6 = scmp.ge.s32.totalorder %s689_s17, 1  ;;  %p103_p7 = scmp.eq.s32.totalorder %s102_s23, 0 }
   0xb   : > { %p760_p8 = por %p122_p5, %p121_p3  ;;  %p159_p9 = scmp.lt.s32.totalorder %s689_s17, 3 }
   0xc   : > { %s766_s25 = scalar_select %p103_p7, %s677_s14, %s105_s21  }
   0xd   : > { %p160_p10 = pnand %p528_p6, %p159_p9 }
   0xe   : > { %p187_p11 = scmp.lt.s32.totalorder (!%p160_p10), %s681_s15, 1  ;;  %s184_s11 = sand.u32 (!%p160_p10), 1, %s673_s13  }
   0xf   : > { %163 = sbr.rel (%p160_p10) target bundleno = 450 (0x1c2), region = 32  ;;  %s451_s21 = scalar_lea.hbm (!%p160_p10), %s873_s3, %s681_s15 }
  0x10   : > { %s185_s23 = scalar_lea.vmem (!%p160_p10), [#allocation3], %s184_s11  ;;  %s455_s27 = sshll.u32 (!%p160_p10), %s451_s21, 4  ;;  %s456_s27 = int_to_ptr.hbm [resolvable:$true] %s455_s27 }
  0x11   : > { %s453_s26 = sshll.u32 (!%p160_p10), %s185_s23, 4  ;;  %s443_s28 = scalar_lea.sflag (!%p160_p10), [#allocation4], %s184_s11  ;;  %s454_s26 = int_to_ptr.vmem [resolvable:$true] %s453_s26 }
  0x12   : > { %s625_s29 = sshra.s32 (!%p160_p10), %s456_s27, 4  ;;  %s626_s29 = int_to_ptr.hbm [resolvable:$true] %s625_s29 }
  0x13   : > { %p632_p1 = scmp.lt.s32.totalorder (!%p160_p10), %s626_s29, %s873_s3 }
  0x14   : > { %v221_v0 = vld [vmem:[%s872_s2 + $0x10] sm:$0xff]  ;;  %v691_v1 = vmov 0   ;;  %v219_v2 = vld [vmem:[%s872_s2] sm:$0xff]  ;;  %s188_s30 = scalar_select %p187_p11, %s681_s15, 1  ;;  %vm255_vm0 = vcmask 195584   ;;  %v216_v11 = vld [vmem:[%s871_s1 + $0x18] sm:$0xff] }
  0x15   : > { %609 = vset.pattern.permute.xlu1 %v691_v1  ;;  %608 = vset.pattern.permute.xlu0 %v691_v1  ;;  %v223_v3 = vld [vmem:[%s872_s2 + $0x20] sm:$0xff]  ;;  %v222_v12 = vld [vmem:[%s872_s2 + $0x18] sm:$0xff]  ;;  %v220_v13 = vld [vmem:[%s872_s2 + $0x8] sm:$0xff]  ;;  %vm200_vm1 = vcmask 7168   ;;  %v692_v21 = vmov 0.0   ;;  %vm440_vm2 = vcmask 385024  }
  0x16   : > { %237 = vperm.xlu1 %609, %v221_v0   ;;  %227 = vperm.xlu0 %608, %v219_v2   ;;  %s550_s6 = smul.u32 48, %s188_s30  ;;  %v213_v10 = vld [vmem:[%s871_s1] sm:$0xff]  ;;  %v224_v14 = vld [vmem:[%s872_s2 + $0x28] sm:$0xff]  ;;  %v215_v17 = vld [vmem:[%s871_s1 + $0x10] sm:$0xff]  ;;  %201 = vst.msk [vmem:[#allocation2] sm:$0xff] %vm200_vm1, %v692_v21  ;;  %s627_s30 = scalar_lea.hbm %s626_s29, 1 }
  0x17   : > { %610 = vset.pattern.permute.xlu2 %v691_v1  ;;  %v214_v15 = vld [vmem:[%s871_s1 + $0x8] sm:$0xff]  ;;  %v217_v16 = vld [vmem:[%s871_s1 + $0x20] sm:$0xff]  ;;  %202 = vst.msk [vmem:[#allocation2 + $0x8] sm:$0xff] %vm200_vm1, %v692_v21  ;;  %p628_p12 = scmp.ne.s32.totalorder %s626_s29, %s627_s30  ;;  %s631_s15 = scalar_lea.hbm %s873_s3, 2 }
  0x18   : > { %247 = vperm.xlu2 %610, %v223_v3   ;;  %s194_s9 = scalar_lea.vmem %s870_s0, %s550_s6  ;;  %v218_v18 = vld [vmem:[%s871_s1 + $0x28] sm:$0xff]  ;;  %203 = vst.msk [vmem:[#allocation2 + $0x10] sm:$0xff] %vm200_vm1, %v692_v21  ;;  %p633_p2 = scmp.lt.s32.totalorder %s631_s15, %s627_s30 }
  0x19   : > { %v211_v4 = vld [vmem:[%s194_s9 + $0x20] sm:$0xff]  ;;  %v212_v5 = vld [vmem:[%s194_s9 + $0x28] sm:$0xff]  ;;  %v209_v6 = vld [vmem:[%s194_s9 + $0x10] sm:$0xff]  ;;  %204 = vst.msk [vmem:[#allocation2 + $0x18] sm:$0xff] %vm200_vm1, %v692_v21  ;;  %p629_p13 = pnand %p628_p12, %p753_p4 }
  0x1a   : > { %287 = vmatpush.msra.mxu0 %v211_v4  ;;  %544 = vmatpush.msra.mxu2 %v211_v4  ;;  %v210_v7 = vld [vmem:[%s194_s9 + $0x18] sm:$0xff]  ;;  %v207_v8 = vld [vmem:[%s194_s9] sm:$0xff]  ;;  %v208_v9 = vld [vmem:[%s194_s9 + $0x8] sm:$0xff]  ;;  %205 = vst.msk [vmem:[#allocation2 + $0x20] sm:$0xff] %vm200_vm1, %v692_v21  ;;  %p634_p3 = por %p633_p2, %p632_p1 }
  0x1b   : > { %322 = vmatpush.msra.mxu1 %v212_v5  ;;  %547 = vmatpush.msra.mxu3 %v212_v5  ;;  %206 = vst.msk [vmem:[#allocation2 + $0x28] sm:$0xff] %vm200_vm1, %v692_v21  ;;  %p630_p0 = pneg %p629_p13 }
  0x1c   : > { %288 = vmatpush.msra.mxu0 %v209_v6  ;;  %545 = vmatpush.msra.mxu2 %v209_v6 }
  0x1d   : > { %323 = vmatpush.msra.mxu1 %v210_v7  ;;  %548 = vmatpush.msra.mxu3 %v210_v7  ;;  %v356_v4 = vld [vmem:[#allocation2] sm:$0xff]  ;;  %p635_p5 = pnand %p634_p3, %p630_p0 }
  0x1e   : > { %289 = vmatpush.msra.mxu0 %v207_v8  ;;  %546 = vmatpush.msra.mxu2 %v207_v8 }
  0x1f   : > { %324 = vmatpush.msra.mxu1 %v208_v9  ;;  %549 = vmatpush.msra.mxu3 %v208_v9  ;;  %v357_v9 = vld [vmem:[#allocation2 + $0x8] sm:$0xff] }
  0x20   : > { %530 = vmatmul.msk.f32.vlgmr.msra.gmra.mxu0 %vm255_vm0, %v213_v10  ;;  %533 = vmatmul.msk.f32.vlgmr.msra.gmra.mxu2 %vm255_vm0, %v216_v11  ;;  %v359_v7 = vld [vmem:[#allocation2 + $0x18] sm:$0xff] }
  0x21   : > { %536 = vmatmul.msk.f32.vlgmr.msra.gmra.mxu1 %vm255_vm0, %v213_v10  ;;  %539 = vmatmul.msk.f32.vlgmr.msra.gmra.mxu3 %vm255_vm0, %v216_v11 }
  0x22   : > { %242 = vperm.xlu1 %609, %v222_v12   ;;  %232 = vperm.xlu0 %608, %v220_v13  }
  0x23   : > { %252 = vperm.xlu2 %610, %v224_v14  }
  0x28   : > { %531 = vmatmul.msk.f32.gmra.mxu0 %vm255_vm0, %v214_v15  ;;  %534 = vmatmul.msk.f32.gmra.mxu2 %vm255_vm0, %v217_v16 }
  0x29   : > { %537 = vmatmul.msk.f32.gmra.mxu1 %vm255_vm0, %v214_v15  ;;  %540 = vmatmul.msk.f32.gmra.mxu3 %vm255_vm0, %v217_v16  ;;  %v360_v15 = vld [vmem:[#allocation2 + $0x20] sm:$0xff]  ;;  %v358_v16 = vld [vmem:[#allocation2 + $0x10] sm:$0xff] }
  0x30   : > { %532 = vmatmul.msk.f32.gmra.mxu0 %vm255_vm0, %v215_v17  ;;  %535 = vmatmul.msk.f32.gmra.mxu2 %vm255_vm0, %v218_v18 }
  0x31   : > { %538 = vmatmul.msk.f32.gmra.mxu1 %vm255_vm0, %v215_v17  ;;  %541 = vmatmul.msk.f32.gmra.mxu3 %vm255_vm0, %v218_v18 }
  0x72   : > { %v248_v41 = vpop.permute.xlu2 %247 }
  0x7d   : > { %v253_v58 = vpop.permute.xlu2 %252 }
  0x88   : > { %v238_v19 = vpop.permute.xlu1 %237  ;;  %v228_v20 = vpop.permute.xlu0 %227 }
  0x94   : > { %v243_v28 = vpop.permute.xlu1 %242  ;;  %v233_v33 = vpop.permute.xlu0 %232 }
  0x9d   : > { %v291_v22 = vpop.f32.mrf.mxu0 }
  0x9e   : > { %v292_v23 = vadd.f32 %v291_v22, %v228_v20  ;;  %v326_v24 = vpop.f32.mrf.mxu1 }
  0x9f   : > { %v327_v25 = vadd.f32 %v326_v24, %v228_v20 }
  0xa0   : > { %v344_v26 = vmax.f32 %v292_v23, 0.0  ;;  %v361_v23 = vld [vmem:[#allocation2 + $0x28] sm:$0xff] }
  0xa1   : > { %v345_v27 = vmax.f32 %v327_v25, 0.0 }
  0xa3   : > { %v300_v29 = vpop.f32.mrf.mxu2  ;;  %v362_v30 = vadd.f32 %v345_v27, %v344_v26 }
  0xa4   : > { %v301_v31 = vadd.f32 %v300_v29, %v243_v28  ;;  %v335_v32 = vpop.f32.mrf.mxu3 }
  0xa5   : > { %v336_v34 = vadd.f32 %v335_v32, %v243_v28  ;;  %363 = vadd.xlane.f32.xlu0 %v362_v30  ;;  %v294_v35 = vpop.f32.mrf.mxu0 }
  0xa6   : > { %v350_v36 = vmax.f32 %v301_v31, 0.0  ;;  %v295_v37 = vadd.f32 %v294_v35, %v233_v33  ;;  %v329_v38 = vpop.f32.mrf.mxu1 }
  0xa7   : > { %v351_v39 = vmax.f32 %v336_v34, 0.0  ;;  %v330_v40 = vadd.f32 %v329_v38, %v233_v33 }
  0xa8   : > { %v346_v42 = vmax.f32 %v295_v37, 0.0 }
  0xa9   : > { %v347_v43 = vmax.f32 %v330_v40, 0.0  ;;  %v371_v44 = vadd.f32 %v351_v39, %v350_v36 }
  0xab   : > { %372 = vadd.xlane.f32.xlu2 %v371_v44  ;;  %v365_v45 = vadd.f32 %v347_v43, %v346_v42  ;;  %v303_v46 = vpop.f32.mrf.mxu2 }
  0xac   : > { %v304_v47 = vadd.f32 %v303_v46, %v248_v41  ;;  %v338_v48 = vpop.f32.mrf.mxu3 }
  0xad   : > { %366 = vadd.xlane.f32.xlu1 %v365_v45  ;;  %v297_v49 = vpop.f32.mrf.mxu0  ;;  %v339_v50 = vadd.f32 %v338_v48, %v248_v41 }
  0xae   : > { %v298_v51 = vadd.f32 %v297_v49, %v238_v19  ;;  %v332_v52 = vpop.f32.mrf.mxu1  ;;  %v352_v53 = vmax.f32 %v304_v47, 0.0 }
  0xaf   : > { %v333_v54 = vadd.f32 %v332_v52, %v238_v19  ;;  %v353_v55 = vmax.f32 %v339_v50, 0.0 }
  0xb0   : > { %v348_v56 = vmax.f32 %v298_v51, 0.0 }
  0xb1   : > { %v349_v57 = vmax.f32 %v333_v54, 0.0  ;;  %v374_v59 = vadd.f32 %v353_v55, %v352_v53 }
  0xb3   : > { %v368_v60 = vadd.f32 %v349_v57, %v348_v56  ;;  %v306_v61 = vpop.f32.mrf.mxu2  ;;  %375 = vadd.xlane.f32.xlu0 %v374_v59 }
  0xb4   : > { %v307_v62 = vadd.f32 %v306_v61, %v253_v58  ;;  %v341_v63 = vpop.f32.mrf.mxu3 }
  0xb5   : > { %369 = vadd.xlane.f32.xlu2 %v368_v60  ;;  %v342_v0 = vadd.f32 %v341_v63, %v253_v58 }
  0xb6   : > { %v354_v1 = vmax.f32 %v307_v62, 0.0 }
  0xb7   : > { %v355_v2 = vmax.f32 %v342_v0, 0.0 }
  0xb9   : > { %v377_v3 = vadd.f32 %v355_v2, %v354_v1 }
  0xbb   : > { %378 = vadd.xlane.f32.xlu1 %v377_v3 }
 0x118   : > { %v364_v5 = vpop.xlane.xlu0 %363 }
 0x119   : > { %v380_v6 = vadd.f32 %v364_v5, %v356_v4 }
 0x11b   : > { %387 = vst.msk [vmem:[#allocation2] sm:$0xff] %vm200_vm1, %v380_v6 }
 0x11e   : > { %v373_v8 = vpop.xlane.xlu2 %372 }
 0x11f   : > { %v383_v10 = vadd.f32 %v373_v8, %v359_v7 }
 0x120   : > { %v367_v11 = vpop.xlane.xlu1 %366 }
 0x121   : > { %390 = vst.msk [vmem:[#allocation2 + $0x18] sm:$0xff] %vm200_vm1, %v383_v10  ;;  %v381_v12 = vadd.f32 %v367_v11, %v357_v9 }
 0x122   : > { %v396_v13 = vld [vmem:[#allocation2] sm:$0xff] }
 0x123   : > { %388 = vst.msk [vmem:[#allocation2 + $0x8] sm:$0xff] %vm200_vm1, %v381_v12  ;;  %v402_v14 = vmul.f32 0.00390625, %v396_v13 }
 0x125   : > { %408 = vxpose.xlu2.b32.start [1/6] (short) (narrow) %v402_v14, 8 }
 0x126   : > { %v376_v17 = vpop.xlane.xlu0 %375 }
 0x127   : > { %v384_v18 = vadd.f32 %v376_v17, %v360_v15 }
 0x128   : > { %v370_v19 = vpop.xlane.xlu2 %369  ;;  %v399_v28 = vld [vmem:[#allocation2 + $0x18] sm:$0xff] }
 0x129   : > { %v382_v20 = vadd.f32 %v370_v19, %v358_v16  ;;  %391 = vst.msk [vmem:[#allocation2 + $0x20] sm:$0xff] %vm200_vm1, %v384_v18  ;;  %v405_v29 = vmul.f32 0.00390625, %v399_v28 }
 0x12a   : > { %v397_v21 = vld [vmem:[#allocation2 + $0x8] sm:$0xff] }
 0x12b   : > { %389 = vst.msk [vmem:[#allocation2 + $0x10] sm:$0xff] %vm200_vm1, %v382_v20  ;;  %v403_v22 = vmul.f32 0.00390625, %v397_v21 }
 0x12d   : > { %409 = vxpose.xlu2.b32.cont [2/6] (short) (narrow) %v403_v22, 8 }
 0x12e   : > { %v379_v24 = vpop.xlane.xlu1 %378 }
 0x12f   : > { %v385_v25 = vadd.f32 %v379_v24, %v361_v23 }
 0x130   : > { %v400_v30 = vld [vmem:[#allocation2 + $0x20] sm:$0xff] }
 0x131   : > { %392 = vst.msk [vmem:[#allocation2 + $0x28] sm:$0xff] %vm200_vm1, %v385_v25  ;;  %v406_v31 = vmul.f32 0.00390625, %v400_v30 }
 0x132   : > { %v398_v26 = vld [vmem:[#allocation2 + $0x10] sm:$0xff] }
 0x133   : > { %v404_v27 = vmul.f32 0.00390625, %v398_v26 }
 0x135   : > { %410 = vxpose.xlu2.b32.cont [3/6] (short) (narrow) %v404_v27, 8 }
 0x138   : > { %v401_v32 = vld [vmem:[#allocation2 + $0x28] sm:$0xff] }
 0x139   : > { %v407_v33 = vmul.f32 0.00390625, %v401_v32 }
 0x13d   : > { %411 = vxpose.xlu2.b32.cont [4/6] (short) (narrow) %v405_v29, 8 }
 0x145   : > { %412 = vxpose.xlu2.b32.cont [5/6] (short) (narrow) %v406_v31, 8 }
 0x14d   : > { %413 = vxpose.xlu2.b32.end [6/6] (short) (narrow) %v407_v33, 8 }
 0x1be   : > { %v424_v34 = vpop.trf.xlu2 }
 0x1bf   : > { %441 = vst.msk [vmem:[%s185_s23] sm:$0x1] %vm440_vm2, %v424_v34 }
 0x1c0   : > { %638 = shalt.err (!%p635_p5)
}
 0x1c1   : > { %551 = dma.vmem_to_hbm [thread:$0]  (%p753_p4), %s454_s26, 16, %s456_s27, %s443_s28  }
 0x1c2 PF: > { %p557_p6 = scmp.ge.s32.totalorder %s689_s17, 2  ;;  %s467_s8 = sand.u32 1, %s669_s12  }
 0x1c3   : > { %s468_s9 = scalar_lea.sflag [#allocation4], %s467_s8 }
 0x1c4   : > { %p554_p7 = pnand %p557_p6, %p760_p8 }
 0x1c6   : > { %p555_p9 = pneg %p554_p7 }
 0x1c8   : > { %664 = dma.done.wait (%p555_p9), %s468_s9, 16  }
 0x1c9   : > { %666 = vsyncadd (%p555_p9), %s468_s9, 4294967280  ;;  %s16_s17 = sadd.s32 1, %s689_s17   ;;  %s876_s12 = smov %s673_s13 }
 0x1ca   : > { %p13_p10 = scmp.ge.s32.totalorder %s16_s17, 4   ;;  %s877_s13 = smov %s677_s14 }
 0x1cb   : > { %s878_s14 = smov %s766_s25  ;;  %s879_s15 = smov %s685_s16 }
 0x1cc   : > { %s880_s16 = smov %s882_s20  ;;  %15 = sbr.rel (!%p13_p10) target bundleno = 4 (0x4), region = 75 }
 0x1d1   :  { %473 = vsyncpa [#allocation4], 1 }
 0x1d2   :  { %475 = vsyncpa [#allocation4 + $0x1], 1 }

</bundles_post_ra>
